<compile_context>
chip_gen: v7x
topology: tpu7x:2x2x1
jax: 0.10.0
libtpu: 0.0.40
codegen_flags: <defaults>
</compile_context>

<pallas_src>
import jax
import jax.numpy as jnp
from jax import lax
from jax.experimental import pallas as pl
from jax.experimental.pallas import tpu as pltpu


_NEG_INF = -1.0e30
_VOCAB_PAD_BIAS = -1.0e30  # pushes padded vocab columns out of the softmax


def _round_up(x, m):
    return ((x + m - 1) // m) * m


def _vmem_capacity_bytes():
    try:
        return int(pltpu.get_tpu_info().vmem_capacity_bytes)
    except Exception:
        return 64 << 20  # conservative: v7x per-TensorCore VMEM


def _lane_align():
    # v6e / v7x MXU is 2x256x256 -> 256-align K/N; v4 / v5e (128-wide MXU)
    # stay at 128 (less padding, already optimal).
    try:
        kind = jax.devices()[0].device_kind.lower()
        if "v4" in kind or "v5" in kind:
            return 128
    except Exception:
        pass
    return 256


# -----------------------------------------------------------------------------
# Pallas kernel: ctc_lo linear + log_softmax over vocab + CTC label gather
# -----------------------------------------------------------------------------
def _ctc_lo_gather_kernel(x_ref, w_ref, b_ref, ext_ref, out_ref):
    # x_ref:  (1, tq, Ep) bf16     w_ref: (Ep, Vp) bf16     b_ref: (1, Vp) f32
    # ext_ref:(1, 1,  Sp) int32    out_ref: (1, tq, Sp) f32
    logits = jnp.dot(
        x_ref[0], w_ref[...], preferred_element_type=jnp.float32
    ) + b_ref[...]                                     # f32 accumulation + bias
    m = jnp.max(logits, axis=-1, keepdims=True)        # f32 softmax math
    z = logits - m
    lse = jnp.log(jnp.sum(jnp.exp(z), axis=-1, keepdims=True))
    logp = z - lse                                     # (tq, Vp) f32

    vp = w_ref.shape[1]
    sp = ext_ref.shape[-1]
    ext = ext_ref[0]                                   # (1, Sp) int32
    v_iota = lax.broadcasted_iota(jnp.int32, (vp, sp), 0)
    onehot = (v_iota == ext).astype(jnp.float32)       # exact 0/1 gather matrix
    # Exact column gather via a small f32 MXU matmul: (tq,Vp)@(Vp,Sp)->(tq,Sp).
    out_ref[0] = jnp.dot(logp, onehot, preferred_element_type=jnp.float32)


def ctc_lo_gather_logprobs(hs_pad, w_p, b_p, ext, *, tile_rows=256):
    """hs_pad: (B, T, E); w_p: (Ep, Vp) bf16 (padded); b_p: (1, Vp) f32 (padded,
    -1e30 on padded vocab cols); ext: (B, S) int32 blank-interleaved labels.
    Returns gathered log-probs (B, T, S) float32."""
    b, t, e = hs_pad.shape
    e_pad, v_pad = w_p.shape
    s = ext.shape[1]
    s_pad = _round_up(max(s, 1), 128)            # lane-dense store width

    # Time tile: MXU-friendly, divides padded T; keep >= 2 grid steps.
    tq = max(8, min(int(tile_rows), _round_up(t, 8)))
    t_pad = _round_up(t, tq)
    if b * (t_pad // tq) < 2 and tq > 8:
        tq = max(8, tq // 2)
        t_pad = _round_up(t, tq)

    x_p = jnp.pad(hs_pad.astype(jnp.bfloat16),
                  ((0, 0), (0, t_pad - t), (0, e_pad - e)))
    ext_p = jnp.pad(ext.astype(jnp.int32), ((0, 0), (0, s_pad - s)))
    ext_p = ext_p.reshape(b, 1, s_pad)

    grid = (b, t_pad // tq)

    # VMEM budget: single-buffered weight/bias + double-buffered x/ext/out
    # tiles + compiler scratch for the (tq, Vp) f32 logits and (Vp, Sp) gather.
    est_bytes = (
        e_pad * v_pad * 2 + v_pad * 4
        + 2 * (tq * e_pad * 2 + s_pad * 4 + tq * s_pad * 4)
        + tq * v_pad * 4 + v_pad * s_pad * 4
        + (2 << 20)
    )
    cparams = {"dimension_semantics": ("parallel", "parallel")}
    if est_bytes > (32 << 20):
        cap = int(_vmem_capacity_bytes() * 0.85)
        cparams["vmem_limit_bytes"] = int(min(est_bytes, cap))

    def build(single_buffer_weights):
        pm = {"pipeline_mode": pl.Buffered(1)} if single_buffer_weights else {}
        return pl.pallas_call(
            _ctc_lo_gather_kernel,
            out_shape=jax.ShapeDtypeStruct((b, t_pad, s_pad), jnp.float32),
            grid_spec=pltpu.PrefetchScalarGridSpec(
                num_scalar_prefetch=0,
                grid=grid,
                in_specs=[
                    pl.BlockSpec((1, tq, e_pad), lambda bi, ti: (bi, ti, 0)),
                    pl.BlockSpec((e_pad, v_pad), lambda bi, ti: (0, 0), **pm),
                    pl.BlockSpec((1, v_pad), lambda bi, ti: (0, 0), **pm),
                    pl.BlockSpec((1, 1, s_pad), lambda bi, ti: (bi, 0, 0)),
                ],
                out_specs=pl.BlockSpec((1, tq, s_pad),
                                       lambda bi, ti: (bi, ti, 0)),
            ),
            compiler_params=pltpu.CompilerParams(**cparams),
        )

    try:
        out = build(True)(x_p, w_p, b_p, ext_p)
    except Exception:
        # Fallback: default double-buffering if Buffered(1) is rejected.
        out = build(False)(x_p, w_p, b_p, ext_p)

    return out[:, :t, :s]                        # tiny (B, T, S) slice only


# -----------------------------------------------------------------------------
# CTC loss (forward/alpha recursion) on the pre-gathered log-probs, blank = 0
# (warp_ctc applies softmax internally; feeding log-probs is equivalent.)
# -----------------------------------------------------------------------------
def _lse3(a, b, c):
    m = jnp.maximum(jnp.maximum(a, b), c)
    return m + jnp.log(jnp.exp(a - m) + jnp.exp(b - m) + jnp.exp(c - m))


def _ctc_forward_single(lp_ext, ilen, ext, olen, blank=0):
    # lp_ext: (T, S) log-probs gathered at the extended label positions.
    t_max, s_max = lp_ext.shape

    ext_prev2 = jnp.concatenate([jnp.full((2,), -1, jnp.int32), ext[:-2]])
    skip_ok = (ext != blank) & (ext != ext_prev2)

    alpha0 = jnp.full((s_max,), _NEG_INF, jnp.float32)
    alpha0 = alpha0.at[0].set(lp_ext[0, 0])                       # logp[0, blank]
    if s_max > 1:
        alpha0 = alpha0.at[1].set(
            jnp.where(olen > 0, lp_ext[0, 1], _NEG_INF)           # logp[0, ext[1]]
        )

    def step(alpha, xs):
        lp_t, t = xs
        a1 = jnp.concatenate([jnp.array([_NEG_INF], jnp.float32), alpha[:-1]])
        a2 = jnp.concatenate([jnp.full((2,), _NEG_INF, jnp.float32), alpha[:-2]])
        a2 = jnp.where(skip_ok, a2, _NEG_INF)
        new = _lse3(alpha, a1, a2) + lp_t
        new = jnp.where(t < ilen, new, alpha)     # freeze past the input length
        return new, None

    xs = (lp_ext[1:].astype(jnp.float32), jnp.arange(1, t_max))
    alpha, _ = lax.scan(step, alpha0, xs)

    s_last = 2 * olen
    a_last = alpha[s_last]
    a_prev = jnp.where(olen > 0, alpha[jnp.maximum(s_last - 1, 0)], _NEG_INF)
    return -jnp.logaddexp(a_last, a_prev)


# -----------------------------------------------------------------------------
# CTC module forward (synthetic parameters, dropout_rate = 0.0)
# -----------------------------------------------------------------------------
class CTCPallas:
    def __init__(self, odim, eprojs, dropout_rate=0.0, *, key=None):
        self.odim = odim
        self.eprojs = eprojs
        self.dropout_rate = dropout_rate
        self.ignore_id = -1
        self.reduce = True
        if key is None:
            key = jax.random.PRNGKey(0)
        kw, kb = jax.random.split(key)
        bound = 1.0 / (eprojs ** 0.5)
        # torch.nn.Linear default init: U(-1/sqrt(in), 1/sqrt(in))
        self.w = jax.random.uniform(kw, (eprojs, odim), jnp.float32, -bound, bound)
        self.b = jax.random.uniform(kb, (odim,), jnp.float32, -bound, bound)

        # Cache the MXU-ready padded weight/bias once (not per forward call).
        align = _lane_align()
        self._e_pad = _round_up(eprojs, align)
        self._v_pad = _round_up(odim, align)
        self._w_p = jnp.pad(
            self.w.astype(jnp.bfloat16),
            ((0, self._e_pad - eprojs), (0, self._v_pad - odim)))
        self._b_p = jnp.pad(
            self.b.astype(jnp.float32), (0, self._v_pad - odim),
            constant_values=_VOCAB_PAD_BIAS).reshape(1, self._v_pad)

    def __call__(self, hs_pad, hlens, ys_pad):
        """hs_pad: (B, Tmax, E); hlens: (B,) int32; ys_pad: (B, Lmax) int32.
        Returns scalar CTC loss (size-averaged over batch, then summed)."""
        b, t_max, e = hs_pad.shape
        dtype = hs_pad.dtype

        # label bookkeeping (ys = y[y != ignore_id]; olens = lengths)
        valid = ys_pad != self.ignore_id
        olens = jnp.sum(valid, axis=1).astype(jnp.int32)
        labels = jnp.where(valid, ys_pad, 0).astype(jnp.int32)

        # blank-interleaved extended labels: ext = [blank, y1, blank, ..., blank]
        u_max = labels.shape[1]
        s_max = 2 * u_max + 1
        ext = jnp.zeros((b, s_max), jnp.int32).at[:, 1::2].set(labels)

        # dropout (p = 0.0 -> identity), then fused ctc_lo linear + log-softmax
        # + label gather in Pallas (bf16 MXU inputs, f32 math) -> (B, T, S).
        lp_ext = ctc_lo_gather_logprobs(hs_pad, self._w_p, self._b_p, ext)

        # No (B,T,V)->(T,B,V) transpose: vmap the DP over the batch axis.
        per_ex = jax.vmap(_ctc_forward_single, in_axes=(0, 0, 0, 0))(
            lp_ext, hlens.astype(jnp.int32), ext, olens)
        # warp_ctc.CTCLoss(size_average=True): average over the minibatch
        loss = jnp.sum(per_ex) / b
        if self.reduce:
            loss = jnp.sum(loss)
        return loss.astype(dtype)


if __name__ == "__main__":
    B, T, E, V, L = 2, 8, 32, 16, 4

    key = jax.random.PRNGKey(0)
    k_h, k_p = jax.random.split(key)
    hs_pad = jax.random.normal(k_h, (B, T, E), dtype=jnp.float32)
    hlens = jnp.array([8, 6], dtype=jnp.int32)
    ys_pad = jnp.array([[3, 5, 2, -1], [7, 1, -1, -1]], dtype=jnp.int32)

    ctc = CTCPallas(odim=V, eprojs=E, dropout_rate=0.0, key=k_p)
    loss = ctc(hs_pad, hlens, ys_pad)
    jax.block_until_ready(loss)
    assert loss.shape == () and jnp.isfinite(loss)
    print("KERNEL_OK")
</pallas_src>

<mosaic_0001>
module attributes {stable_mosaic.version = 11 : i64} {
  func.func @_ctc_lo_gather_kernel(%arg0: i32, %arg1: i32, %arg2: memref<1x8x256xbf16, #tpu.memory_space<vmem>>, %arg3: memref<256x256xbf16, #tpu.memory_space<vmem>>, %arg4: memref<1x256xf32, #tpu.memory_space<vmem>>, %arg5: memref<1x1x128xi32, #tpu.memory_space<vmem>>, %arg6: memref<1x8x128xf32, #tpu.memory_space<vmem>>) attributes {dimension_semantics = [#tpu.dimension_semantics<parallel>, #tpu.dimension_semantics<parallel>], iteration_bounds = array<i64: 2, 1>, scalar_prefetch = 0 : i64, scratch_operands = 0 : i64, tpu.core_type = #tpu.core_type<tc>, window_params = [{transform_indices = @transform_0, window_bounds = array<i64: 1, 8, 256>}, {pipeline_mode = #tpu.pipeline_mode<synchronous>, transform_indices = @transform_1, window_bounds = array<i64: 256, 256>}, {pipeline_mode = #tpu.pipeline_mode<synchronous>, transform_indices = @transform_2, window_bounds = array<i64: 1, 256>}, {transform_indices = @transform_3, window_bounds = array<i64: 1, 1, 128>}, {transform_indices = @transform_4, window_bounds = array<i64: 1, 8, 128>}]} {
    %c0 = arith.constant 0 : index
    %c0_0 = arith.constant 0 : index
    %c0_1 = arith.constant 0 : index
    %0 = vector.load %arg2[%c0, %c0_0, %c0_1] : memref<1x8x256xbf16, #tpu.memory_space<vmem>>, vector<1x8x256xbf16>
    %1 = vector.shape_cast %0 : vector<1x8x256xbf16> to vector<8x256xbf16>
    %c0_2 = arith.constant 0 : index
    %c0_3 = arith.constant 0 : index
    %2 = vector.load %arg3[%c0_2, %c0_3] : memref<256x256xbf16, #tpu.memory_space<vmem>>, vector<256x256xbf16>
    %cst = arith.constant dense<0.000000e+00> : vector<8x256xf32>
    %3 = tpu.matmul %1, %2, %cst {dimension_numbers = #tpu.dot_dimension_numbers<[1], [0], [0], [1], [0, 0, 1, 1], [], []>} : vector<8x256xbf16>, vector<256x256xbf16>, vector<8x256xf32> -> vector<8x256xf32>
    %c0_4 = arith.constant 0 : index
    %c0_5 = arith.constant 0 : index
    %4 = vector.load %arg4[%c0_4, %c0_5] : memref<1x256xf32, #tpu.memory_space<vmem>>, vector<1x256xf32>
    %5 = vector.broadcast %4 : vector<1x256xf32> to vector<8x256xf32>
    %6 = arith.addf %3, %5 : vector<8x256xf32>
    %cst_6 = arith.constant dense<0xFF800000> : vector<8xf32>
    %7 = vector.multi_reduction <maximumf>, %6, %cst_6 [1] : vector<8x256xf32> to vector<8xf32>
    %8 = vector.shape_cast %7 : vector<8xf32> to vector<8x1xf32>
    %9 = vector.broadcast %8 : vector<8x1xf32> to vector<8x256xf32>
    %10 = arith.subf %6, %9 : vector<8x256xf32>
    %11 = math.exp %10 : vector<8x256xf32>
    %cst_7 = arith.constant dense<0.000000e+00> : vector<8xf32>
    %12 = vector.multi_reduction <add>, %11, %cst_7 [1] : vector<8x256xf32> to vector<8xf32>
    %13 = vector.shape_cast %12 : vector<8xf32> to vector<8x1xf32>
    %14 = math.log %13 : vector<8x1xf32>
    %15 = vector.broadcast %14 : vector<8x1xf32> to vector<8x256xf32>
    %16 = arith.subf %10, %15 : vector<8x256xf32>
    %c0_8 = arith.constant 0 : index
    %c0_9 = arith.constant 0 : index
    %c0_10 = arith.constant 0 : index
    %17 = vector.load %arg5[%c0_8, %c0_9, %c0_10] : memref<1x1x128xi32, #tpu.memory_space<vmem>>, vector<1x1x128xi32>
    %18 = vector.shape_cast %17 : vector<1x1x128xi32> to vector<1x128xi32>
    %19 = tpu.iota {dimensions = array<i32: 0>} : vector<256x128xi32>
    %20 = vector.broadcast %18 : vector<1x128xi32> to vector<256x128xi32>
    %21 = arith.cmpi eq, %19, %20 : vector<256x128xi32>
    %22 = arith.extui %21 : vector<256x128xi1> to vector<256x128xi32>
    %23 = arith.sitofp %22 : vector<256x128xi32> to vector<256x128xf32>
    %cst_11 = arith.constant dense<0.000000e+00> : vector<8x128xf32>
    %24 = tpu.matmul %16, %23, %cst_11 {dimension_numbers = #tpu.dot_dimension_numbers<[1], [0], [0], [1], [0, 0, 1, 1], [], []>} : vector<8x256xf32>, vector<256x128xf32>, vector<8x128xf32> -> vector<8x128xf32>
    %c0_12 = arith.constant 0 : index
    %c0_13 = arith.constant 0 : index
    %c0_14 = arith.constant 0 : index
    %25 = vector.load %arg6[%c0_12, %c0_13, %c0_14] : memref<1x8x128xf32, #tpu.memory_space<vmem>>, vector<1x8x128xf32>
    %26 = vector.shape_cast %25 : vector<1x8x128xf32> to vector<8x128xf32>
    %27 = vector.shape_cast %24 : vector<8x128xf32> to vector<1x8x128xf32>
    tpu.vector_store %arg6[%c0_12, %c0_13, %c0_14], %27 {strides = array<i32>} : memref<1x8x128xf32, #tpu.memory_space<vmem>>, vector<1x8x128xf32>,
    return
  }
  func.func @transform_0(%arg0: i32, %arg1: i32) -> (i32, i32, i32) {
    %c0_i32 = arith.constant 0 : i32
    %c0_i32_0 = arith.constant 0 : i32
    return %arg0, %arg1, %c0_i32 : i32, i32, i32
  }
  func.func @transform_1(%arg0: i32, %arg1: i32) -> (i32, i32) {
    %c0_i32 = arith.constant 0 : i32
    %c0_i32_0 = arith.constant 0 : i32
    %c0_i32_1 = arith.constant 0 : i32
    return %c0_i32, %c0_i32_0 : i32, i32
  }
  func.func @transform_2(%arg0: i32, %arg1: i32) -> (i32, i32) {
    %c0_i32 = arith.constant 0 : i32
    %c0_i32_0 = arith.constant 0 : i32
    %c0_i32_1 = arith.constant 0 : i32
    return %c0_i32, %c0_i32_0 : i32, i32
  }
  func.func @transform_3(%arg0: i32, %arg1: i32) -> (i32, i32, i32) {
    %c0_i32 = arith.constant 0 : i32
    %c0_i32_0 = arith.constant 0 : i32
    %c0_i32_1 = arith.constant 0 : i32
    return %arg0, %c0_i32, %c0_i32_0 : i32, i32, i32
  }
  func.func @transform_4(%arg0: i32, %arg1: i32) -> (i32, i32, i32) {
    %c0_i32 = arith.constant 0 : i32
    %c0_i32_0 = arith.constant 0 : i32
    return %arg0, %arg1, %c0_i32 : i32, i32, i32
  }
}

module attributes {stable_mosaic.version = 11 : i64} {
  func.func @_ctc_lo_gather_kernel(%arg0: i32, %arg1: i32, %arg2: memref<1x8x256xbf16, #tpu.memory_space<vmem>>, %arg3: memref<256x256xbf16, #tpu.memory_space<vmem>>, %arg4: memref<1x256xf32, #tpu.memory_space<vmem>>, %arg5: memref<1x1x128xi32, #tpu.memory_space<vmem>>, %arg6: memref<1x8x128xf32, #tpu.memory_space<vmem>>) attributes {dimension_semantics = [#tpu.dimension_semantics<parallel>, #tpu.dimension_semantics<parallel>], iteration_bounds = array<i64: 2, 1>, scalar_prefetch = 0 : i64, scratch_operands = 0 : i64, tpu.core_type = #tpu.core_type<tc>, window_params = [{transform_indices = @transform_0, window_bounds = array<i64: 1, 8, 256>}, {pipeline_mode = #tpu.pipeline_mode<synchronous>, transform_indices = @transform_1, window_bounds = array<i64: 256, 256>}, {pipeline_mode = #tpu.pipeline_mode<synchronous>, transform_indices = @transform_2, window_bounds = array<i64: 1, 256>}, {transform_indices = @transform_3, window_bounds = array<i64: 1, 1, 128>}, {transform_indices = @transform_4, window_bounds = array<i64: 1, 8, 128>}]} {
    %c0 = arith.constant 0 : index
    %c0_0 = arith.constant 0 : index
    %c0_1 = arith.constant 0 : index
    %0 = vector.load %arg2[%c0, %c0_0, %c0_1] : memref<1x8x256xbf16, #tpu.memory_space<vmem>>, vector<1x8x256xbf16>
    %1 = vector.shape_cast %0 : vector<1x8x256xbf16> to vector<8x256xbf16>
    %c0_2 = arith.constant 0 : index
    %c0_3 = arith.constant 0 : index
    %2 = vector.load %arg3[%c0_2, %c0_3] : memref<256x256xbf16, #tpu.memory_space<vmem>>, vector<256x256xbf16>
    %cst = arith.constant dense<0.000000e+00> : vector<8x256xf32>
    %3 = tpu.matmul %1, %2, %cst {dimension_numbers = #tpu.dot_dimension_numbers<[1], [0], [0], [1], [0, 0, 1, 1], [], []>} : vector<8x256xbf16>, vector<256x256xbf16>, vector<8x256xf32> -> vector<8x256xf32>
    %c0_4 = arith.constant 0 : index
    %c0_5 = arith.constant 0 : index
    %4 = vector.load %arg4[%c0_4, %c0_5] : memref<1x256xf32, #tpu.memory_space<vmem>>, vector<1x256xf32>
    %5 = vector.broadcast %4 : vector<1x256xf32> to vector<8x256xf32>
    %6 = arith.addf %3, %5 : vector<8x256xf32>
    %cst_6 = arith.constant dense<0xFF800000> : vector<8xf32>
    %7 = vector.multi_reduction <maximumf>, %6, %cst_6 [1] : vector<8x256xf32> to vector<8xf32>
    %8 = vector.shape_cast %7 : vector<8xf32> to vector<8x1xf32>
    %9 = vector.broadcast %8 : vector<8x1xf32> to vector<8x256xf32>
    %10 = arith.subf %6, %9 : vector<8x256xf32>
    %11 = math.exp %10 : vector<8x256xf32>
    %cst_7 = arith.constant dense<0.000000e+00> : vector<8xf32>
    %12 = vector.multi_reduction <add>, %11, %cst_7 [1] : vector<8x256xf32> to vector<8xf32>
    %13 = vector.shape_cast %12 : vector<8xf32> to vector<8x1xf32>
    %14 = math.log %13 : vector<8x1xf32>
    %15 = vector.broadcast %14 : vector<8x1xf32> to vector<8x256xf32>
    %16 = arith.subf %10, %15 : vector<8x256xf32>
    %c0_8 = arith.constant 0 : index
    %c0_9 = arith.constant 0 : index
    %c0_10 = arith.constant 0 : index
    %17 = vector.load %arg5[%c0_8, %c0_9, %c0_10] : memref<1x1x128xi32, #tpu.memory_space<vmem>>, vector<1x1x128xi32>
    %18 = vector.shape_cast %17 : vector<1x1x128xi32> to vector<1x128xi32>
    %19 = tpu.iota {dimensions = array<i32: 0>} : vector<256x128xi32>
    %20 = vector.broadcast %18 : vector<1x128xi32> to vector<256x128xi32>
    %21 = arith.cmpi eq, %19, %20 : vector<256x128xi32>
    %22 = arith.extui %21 : vector<256x128xi1> to vector<256x128xi32>
    %23 = arith.sitofp %22 : vector<256x128xi32> to vector<256x128xf32>
    %cst_11 = arith.constant dense<0.000000e+00> : vector<8x128xf32>
    %24 = tpu.matmul %16, %23, %cst_11 {dimension_numbers = #tpu.dot_dimension_numbers<[1], [0], [0], [1], [0, 0, 1, 1], [], []>} : vector<8x256xf32>, vector<256x128xf32>, vector<8x128xf32> -> vector<8x128xf32>
    %c0_12 = arith.constant 0 : index
    %c0_13 = arith.constant 0 : index
    %c0_14 = arith.constant 0 : index
    %25 = vector.load %arg6[%c0_12, %c0_13, %c0_14] : memref<1x8x128xf32, #tpu.memory_space<vmem>>, vector<1x8x128xf32>
    %26 = vector.shape_cast %25 : vector<1x8x128xf32> to vector<8x128xf32>
    %27 = vector.shape_cast %24 : vector<8x128xf32> to vector<1x8x128xf32>
    tpu.vector_store %arg6[%c0_12, %c0_13, %c0_14], %27 {strides = array<i32>} : memref<1x8x128xf32, #tpu.memory_space<vmem>>, vector<1x8x128xf32>,
    return
  }
  func.func @transform_0(%arg0: i32, %arg1: i32) -> (i32, i32, i32) {
    %c0_i32 = arith.constant 0 : i32
    %c0_i32_0 = arith.constant 0 : i32
    return %arg0, %arg1, %c0_i32 : i32, i32, i32
  }
  func.func @transform_1(%arg0: i32, %arg1: i32) -> (i32, i32) {
    %c0_i32 = arith.constant 0 : i32
    %c0_i32_0 = arith.constant 0 : i32
    %c0_i32_1 = arith.constant 0 : i32
    return %c0_i32, %c0_i32_0 : i32, i32
  }
  func.func @transform_2(%arg0: i32, %arg1: i32) -> (i32, i32) {
    %c0_i32 = arith.constant 0 : i32
    %c0_i32_0 = arith.constant 0 : i32
    %c0_i32_1 = arith.constant 0 : i32
    return %c0_i32, %c0_i32_0 : i32, i32
  }
  func.func @transform_3(%arg0: i32, %arg1: i32) -> (i32, i32, i32) {
    %c0_i32 = arith.constant 0 : i32
    %c0_i32_0 = arith.constant 0 : i32
    %c0_i32_1 = arith.constant 0 : i32
    return %arg0, %c0_i32, %c0_i32_0 : i32, i32, i32
  }
  func.func @transform_4(%arg0: i32, %arg1: i32) -> (i32, i32, i32) {
    %c0_i32 = arith.constant 0 : i32
    %c0_i32_0 = arith.constant 0 : i32
    return %arg0, %arg1, %c0_i32 : i32, i32, i32
  }
}

</mosaic_0001>

<bundles_post_ra>
// kernel: tpu_custom_call.1
= control target key start
LH: loop header
LB: loop body
LE: loop exit
PB: predicated region body
PF: predicated region fallthrough
CT: control target
= control target key end

     0   :  { %9 = vsyncpa [#allocation3], 0  ;;  %s1663_s0 = inlined_call_operand.hbm [shape: bf16[2,8,256], index: 0, kind: input, shape index: {}]   ;;  %s1664_s1 = inlined_call_operand.hbm [shape: bf16[256,256], index: 1, kind: input, shape index: {}]   ;;  %s1665_s2 = inlined_call_operand.vmem [shape: f32[1,256], index: 2, kind: input, shape index: {}]   ;;  %s1666_s3 = inlined_call_operand.vmem [shape: s32[2,1,128], index: 3, kind: input, shape index: {}]   ;;  %s1667_s4 = inlined_call_operand.hbm [shape: f32[2,8,128], index: 4, kind: output, shape index: {}]  }
   0x1   :  { %11 = vsyncpa [#allocation3 + $0x1], 0 }
   0x2   :  { %12 = vsyncpa [#allocation6], 0 }
   0x3   :  { %13 = vsyncpa [#allocation4], 0 }
   0x4   :  { %15 = vsyncpa [#allocation4 + $0x1], 0  ;;  %s1343_s15 = smov 0   ;;  %s1345_s16 = smov 0  }
   0x5   :  { %s1347_s17 = smov 0   ;;  %s1349_s18 = smov 0  }
   0x6   :  { %s1351_s19 = smov 0   ;;  %s1353_s20 = smov 0  }
   0x7 LB: > { %s851_s21 = sadd.s32 4294967295, %s1310_s20   ;;  %s852_s22 = sadd.s32 4294967294, %s1310_s20   ;;  %s1310_s20 = sphi %s1353_s20, %s21_s20   ;;  %s1306_s19 = sphi %s1351_s19, %s1691_s19   ;;  %s1302_s18 = sphi %s1349_s18, %s1690_s18   ;;  %s1298_s17 = sphi %s1347_s17, %s1689_s17   ;;  %s1294_s16 = sphi %s1345_s16, %s1688_s16   ;;  %s1290_s15 = sphi %s1343_s15, %s1687_s15  }
   0x8   : > { %p55_p0 = scmp.ne.s32.totalorder %s1294_s16, %s1290_s15  ;;  %p1377_p1 = scmp.eq.s32.totalorder %s851_s21, 0 }
   0x9   : > { %p1381_p2 = scmp.eq.s32.totalorder %s851_s21, 1  ;;  %p155_p3 = scmp.eq.s32.totalorder %s852_s22, 1 }
   0xa   : > { %s1672_s23 = scalar_select %p1377_p1, 1, 0 }
   0xb   : > { %s1673_s24 = scalar_select %p1381_p2, 1, 0 }
   0xc   : > { %p1387_p4 = por %p1377_p1, %p55_p0  ;;  %p853_p5 = scmp.ge.s32.totalorder %s1310_s20, 1 }
   0xd   : > { %p1392_p6 = por %p155_p3, %p55_p0  ;;  %p162_p7 = scmp.lt.s32.totalorder %s1310_s20, 3 }
   0xe   : > { %s1674_s25 = scalar_select %p1387_p4, 1, 0 }
   0xf   : > { %s1675_s26 = scalar_select %p1392_p6, 1, 0 }
  0x10   : > { %p1397_p8 = pnand %p853_p5, %p162_p7  ;;  %s1312_s28 = smov [#allocation5]  }
  0x11   : > { %s174_s29 = sshll.u32 %s1312_s28, 4  ;;  %s33_s5 = sadd.s32 1, %s1306_s19  ;;  %s175_s29 = int_to_ptr.vmem [resolvable:$true] %s174_s29 }
  0x12   : > { %s1676_s27 = scalar_select %p1397_p8, 1, 0 }
  0x13   : > { %p1042_p9 = pneg %p1397_p8  ;;  %s1166_s8 = scalar_lea.hbm %s1664_s1, 4096 }
  0x14   : > { %p1167_p12 = scmp.ne.s32.totalorder %s1664_s1, %s1166_s8  ;;  %p1173_p5 = scmp.lt.u32.totalorder %s1166_s8, %s1664_s1 }
  0x15   : > { %p1406_p11 = pnand %p1042_p9, %p1377_p1 }
  0x17   : > { %p1168_p13 = pneg %p1406_p11 }
  0x19   : > { %p1169_p0 = pnand %p1168_p13, %p1167_p12 }
  0x1b   : > { %p1170_p3 = pneg %p1169_p0 }
  0x1d   : > { %p1175_p7 = pnand %p1173_p5, %p1170_p3 }
  0x1f   : > { %1178 = shalt.err (!%p1175_p7)
}
  0x20   : > { %s1179_s13 = scalar_lea.vmem %s175_s29, 4096  ;;  %p1187_p1 = scmp.lt.s32.totalorder %s175_s29, %s175_s29 }
  0x21   : > { %p1180_p9 = scmp.ne.s32.totalorder %s175_s29, %s1179_s13  ;;  %p1188_p4 = scmp.lt.s32.totalorder %s1179_s13, %s1179_s13 }
  0x23   : > { %p1182_p10 = pnand %p1180_p9, %p1168_p13  ;;  %p1189_p8 = por %p1188_p4, %p1187_p1 }
  0x25   : > { %p1183_p6 = pneg %p1182_p10 }
  0x27   : > { %p1190_p2 = pnand %p1189_p8, %p1183_p6 }
  0x29   : > { %1193 = shalt.err (!%p1190_p2)
}
  0x2a   : > { %s1313_s14 = smov 128   ;;  %s1314_s21 = smov 8  }
  0x2b   : > { %1045 = dma.hbm_to_vmem [thread:$0]  (!%p1406_p11), %s1664_s1, 4096, %s175_s29, [#allocation6], %s1313_s14, %s1313_s14, %s1314_s21  }
  0x2c   : > { %p35_p1 = scmp.ge.s32.totalorder %s33_s5, 2  ;;  %s42_s6 = sadd.s32 1, %s1298_s17 }
  0x2d   : > { %p49_p2 = scmp.ne.s32.totalorder %s1298_s17, %s1294_s16  ;;  %p50_p4 = scmp.eq.s32.totalorder %s1310_s20, 0 }
  0x2e   : > { %s1693_s5 = smov (%p35_p1, %s33_s5), 0  ;;  %p1679_p8 = scmp.ne.s32.totalorder %s1673_s24, 0 }
  0x2f   : > { %p1433_p6 = por %p50_p4, %p49_p2  ;;  %s37_s30 = ssub.s32 %s1306_s19, %s1693_s5 }
  0x30   : > { %p1439_p10 = por %p1679_p8, %p49_p2  ;;  %p1055_p12 = scmp.lt.s32.totalorder %s1310_s20, 2 }
  0x31   : > { %p40_p11 = scmp.eq.s32.totalorder %s37_s30, 0  ;;  %s191_s29 = sand.u32 1, %s1298_s17  }
  0x32   : > { %s856_s9 = sshll.u32 %s191_s29, 3  ;;  %s966_s11 = sshll.u32 %s1306_s19, 7 }
  0x33   : > { %s1448_s10 = scalar_select %p40_p11, %s1298_s17, %s42_s6  }
  0x34   : > { %s1454_s14 = scalar_lea.hbm %s1663_s0, %s966_s11  ;;  %s195_s24 = scalar_lea.vmem [#allocation2], %s856_s9 }
  0x35   : > { %s205_s21 = sshll.u32 %s195_s24, 4  ;;  %p1460_p13 = pnand %p1055_p12, %p1433_p6  ;;  %s1456_s21 = int_to_ptr.vmem [resolvable:$true] %s205_s21 }
  0x36   : > { %s192_s28 = scalar_lea.sflag [#allocation3], %s191_s29  ;;  %s1194_s6 = scalar_lea.hbm %s1454_s14, 128 }
  0x37   : > { %p1195_p0 = scmp.ne.s32.totalorder %s1454_s14, %s1194_s6  ;;  %p1196_p3 = pneg %p1460_p13 }
  0x38   : > { %s1199_s11 = scalar_lea.hbm %s1663_s0, 256  ;;  %p1200_p9 = scmp.lt.u32.totalorder %s1454_s14, %s1663_s0 }
  0x39   : > { %p1197_p5 = pnand %p1196_p3, %p1195_p0  ;;  %p1201_p1 = scmp.lt.u32.totalorder %s1199_s11, %s1194_s6 }
  0x3a   : > { %p1203_p4 = scmp.lt.u32.totalorder %s1194_s6, %s1454_s14 }
  0x3b   : > { %p1198_p7 = pneg %p1197_p5  ;;  %p1202_p2 = por %p1201_p1, %p1200_p9 }
  0x3d   : > { %p1204_p6 = por %p1203_p4, %p1202_p2 }
  0x3f   : > { %p1205_p8 = pnand %p1204_p6, %p1198_p7 }
  0x41   : > { %1208 = shalt.err (!%p1205_p8)
}
  0x42   : > { %s1209_s29 = scalar_lea.vmem %s1456_s21, 128  ;;  %s1315_s13 = smov [#allocation2]  }
  0x43   : > { %p1210_p12 = scmp.ne.s32.totalorder %s1456_s21, %s1209_s29  ;;  %s1214_s24 = sshll.u32 %s1315_s13, 4  ;;  %s1215_s24 = int_to_ptr.vmem [resolvable:$false] %s1214_s24 }
  0x44   : > { %s1216_s30 = scalar_lea.vmem %s1215_s24, 256  ;;  %p1217_p5 = scmp.lt.s32.totalorder %s1456_s21, %s1215_s24 }
  0x45   : > { %p1212_p11 = pnand %p1210_p12, %p1196_p3  ;;  %p1218_p9 = scmp.lt.s32.totalorder %s1216_s30, %s1209_s29 }
  0x47   : > { %p1213_p0 = pneg %p1212_p11  ;;  %p1219_p1 = por %p1218_p9, %p1217_p5 }
  0x49   : > { %p1220_p2 = pnand %p1219_p1, %p1213_p0 }
  0x4b   : > { %1223 = shalt.err (!%p1220_p2)
}
  0x4c   : > { %1049 = dma.hbm_to_vmem [thread:$0]  (!%p1460_p13), %s1454_s14, 128, %s1456_s21, %s192_s28  }
  0x4d   : > { %p1682_p7 = scmp.ne.s32.totalorder %s1676_s27, 0 }
  0x4e   : > { %s1492_s6 = sand.u32 (!%p1682_p7), 1, %s1294_s16   ;;  %p1683_p3 = scmp.ne.s32.totalorder (!%p1682_p7), %s1674_s25, 0 }
  0x4f   : > { %220 = sbr.rel (%p1682_p7) target bundleno = 919 (0x397), region = 36  ;;  %s860_s9 = sshll.u32 (!%p1682_p7), %s1492_s6, 3 }
  0x50   : > { %s223_s11 = scalar_lea.sflag (!%p1682_p7), [#allocation3], %s1492_s6  ;;  %s226_s7 = scalar_lea.vmem (!%p1682_p7), [#allocation2], %s860_s9 }
  0x56   : > { %1277 = dma.done.wait (%p1683_p3), %s223_s11, 128  }
  0x57   : > { %1279 = vsyncadd (%p1683_p3), %s223_s11, 4294967168  ;;  %p1684_p13 = scmp.ne.s32.totalorder %s1672_s23, 0 }
  0x59   : > { %1281 = dma.done.wait (%p1684_p13), [#allocation6], 4096  }
  0x5a   : > { %1283 = vsyncadd (%p1684_p13), [#allocation6], 4294963200  ;;  %v1110_v0 = vld [vmem:[#allocation5 + $0x4] ss:$8 sps:$4 sm:$0xff]   ;;  %v1112_v1 = vld [vmem:[#allocation5] ss:$8 sps:$4 sm:$0xff]   ;;  %v296_v35 = vlaneseq }
  0x5b   : > { %473 = vmatprep.subr.bf16.mxu0 %v1110_v0  ;;  %v1113_v2 = vld [vmem:[#allocation5 + $0x14] ss:$8 sps:$4 sm:$0xff]   ;;  %v1115_v3 = vld [vmem:[#allocation5 + $0x10] ss:$8 sps:$4 sm:$0xff]   ;;  %v1116_v4 = vld [vmem:[#allocation5 + $0x24] ss:$8 sps:$4 sm:$0xff]  }
  0x5c   : > { %474 = vmatpush1.bf16.msra.mxu0 %v1112_v1  ;;  %v1118_v5 = vld [vmem:[#allocation5 + $0x20] ss:$8 sps:$4 sm:$0xff]   ;;  %v1119_v6 = vld [vmem:[#allocation5 + $0x34] ss:$8 sps:$4 sm:$0xff]   ;;  %v1121_v7 = vld [vmem:[#allocation5 + $0x30] ss:$8 sps:$4 sm:$0xff]  }
  0x5d   : > { %475 = vmatprep.subr.bf16.mxu0 %v1113_v2  ;;  %v1122_v8 = vld [vmem:[#allocation5 + $0x44] ss:$8 sps:$4 sm:$0xff]   ;;  %v1124_v9 = vld [vmem:[#allocation5 + $0x40] ss:$8 sps:$4 sm:$0xff]   ;;  %v1125_v10 = vld [vmem:[#allocation5 + $0x54] ss:$8 sps:$4 sm:$0xff]  }
  0x5e   : > { %v1127_v11 = vld [vmem:[#allocation5 + $0x50] ss:$8 sps:$4 sm:$0xff]   ;;  %v1128_v12 = vld [vmem:[#allocation5 + $0x64] ss:$8 sps:$4 sm:$0xff]   ;;  %v1130_v15 = vld [vmem:[#allocation5 + $0x60] ss:$8 sps:$4 sm:$0xff]  }
  0x5f   : > { %v261_v13 = vld [vmem:[%s226_s7] sm:$0xff]  ;;  %v1134_v18 = vld [vmem:[#allocation5 + $0x84] ss:$8 sps:$4 sm:$0xff]   ;;  %v1136_v19 = vld [vmem:[#allocation5 + $0x80] ss:$8 sps:$4 sm:$0xff]   ;;  %v1506_v36 = vshrl.u32 %v296_v35, 7 }
  0x60   : > { %476 = vmatpush1.bf16.msra.mxu0 %v1115_v3  ;;  %v864_v14 = vcombine.high %v261_v13, %v261_v13  ;;  %v1131_v16 = vld [vmem:[#allocation5 + $0x74] ss:$8 sps:$4 sm:$0xff]   ;;  %v1133_v17 = vld [vmem:[#allocation5 + $0x70] ss:$8 sps:$4 sm:$0xff]   ;;  %v1140_v22 = vld [vmem:[#allocation5 + $0xa4] ss:$8 sps:$4 sm:$0xff]   ;;  %v863_v34 = vcombine.low %v261_v13, %v261_v13 }
  0x61   : > { %477 = vmatprep.subr.bf16.mxu0 %v1116_v4  ;;  %v1137_v20 = vld [vmem:[#allocation5 + $0x94] ss:$8 sps:$4 sm:$0xff]   ;;  %v1139_v21 = vld [vmem:[#allocation5 + $0x90] ss:$8 sps:$4 sm:$0xff]   ;;  %v1142_v23 = vld [vmem:[#allocation5 + $0xa0] ss:$8 sps:$4 sm:$0xff]  }
  0x62   : > { %505 = vmatprep.mubr.bf16.mxu0 %v864_v14  ;;  %v1143_v24 = vld [vmem:[#allocation5 + $0xb4] ss:$8 sps:$4 sm:$0xff]   ;;  %v1145_v25 = vld [vmem:[#allocation5 + $0xb0] ss:$8 sps:$4 sm:$0xff]   ;;  %v1146_v26 = vld [vmem:[#allocation5 + $0xc4] ss:$8 sps:$4 sm:$0xff]  }
  0x63   : > { %v1148_v27 = vld [vmem:[#allocation5 + $0xc0] ss:$8 sps:$4 sm:$0xff]   ;;  %v1149_v28 = vld [vmem:[#allocation5 + $0xd4] ss:$8 sps:$4 sm:$0xff]   ;;  %v1151_v29 = vld [vmem:[#allocation5 + $0xd0] ss:$8 sps:$4 sm:$0xff]  }
  0x64   : > { %478 = vmatpush1.bf16.msra.mxu0 %v1118_v5  ;;  %v1152_v30 = vld [vmem:[#allocation5 + $0xe4] ss:$8 sps:$4 sm:$0xff]   ;;  %v1154_v31 = vld [vmem:[#allocation5 + $0xe0] ss:$8 sps:$4 sm:$0xff]   ;;  %v1155_v32 = vld [vmem:[#allocation5 + $0xf4] ss:$8 sps:$4 sm:$0xff]  }
  0x65   : > { %479 = vmatprep.subr.bf16.mxu0 %v1119_v6  ;;  %v1157_v33 = vld [vmem:[#allocation5 + $0xf0] ss:$8 sps:$4 sm:$0xff]   ;;  %v298_v37 = vsub.s32 0, %v1506_v36  ;;  %v302_v39 = vsub.s32 1, %v1506_v36  ;;  %p258_p4 = scmp.lt.s32.totalorder %s1302_s18, 1  ;;  %v548_v49 = vadd.s32 128, %v1506_v36 }
  0x66   : > { %v294_v38 = vld [vmem:[%s1665_s2] sm:$0x3]  ;;  %v549_v50 = vadd.s32 136, %v1506_v36  ;;  %v533_v51 = vadd.s32 8, %v1506_v36  ;;  %v550_v52 = vadd.s32 144, %v1506_v36  ;;  %v551_v53 = vadd.s32 152, %v1506_v36 }
  0x67   : > { %v299_v40 = vrot.slane %v294_v38, %v298_v37  ;;  %v303_v41 = vrot.slane %v294_v38, %v302_v39  ;;  %s259_s27 = scalar_select %p258_p4, %s1302_s18, 1  ;;  %v534_v54 = vadd.s32 16, %v1506_v36  ;;  %v535_v55 = vadd.s32 24, %v1506_v36 }
  0x68   : > { %480 = vmatpush1.bf16.msra.mxu0 %v1121_v7  ;;  %v552_v56 = vadd.s32 160, %v1506_v36  ;;  %v553_v57 = vadd.s32 168, %v1506_v36  ;;  %v536_v59 = vadd.s32 32, %v1506_v36  ;;  %v537_v60 = vadd.s32 40, %v1506_v36  ;;  %s963_s28 = sshll.u32 %s1302_s18, 7  ;;  %s257_s12 = scalar_lea.vmem [#allocation7], %s860_s9 }
  0x69   : > { %481 = vmatprep.subr.bf16.mxu0 %v1122_v8  ;;  %s260_s22 = scalar_lea.vmem %s1666_s3, %s259_s27  ;;  %v1316_v61 = vmov 1.0|1.0   ;;  %v554_v62 = vadd.s32 176, %v1506_v36  ;;  %v555_v63 = vadd.s32 184, %v1506_v36  ;;  %v538_v0 = vadd.s32 48, %v1506_v36  ;;  %s750_s29 = sshll.u32 %s257_s12, 4  ;;  %s1616_s29 = int_to_ptr.vmem [resolvable:$true] %s750_s29 }
  0x6a   : > { %v1527_v58 = vld [vmem:[%s260_s22] ss:$0 sm:$0xff]  ;;  %v539_v1 = vadd.s32 56, %v1506_v36  ;;  %v541_v13 = vadd.s32 72, %v1506_v36  ;;  %v558_v14 = vadd.s32 208, %v1506_v36  ;;  %s1614_s30 = scalar_lea.hbm %s1667_s4, %s963_s28  ;;  %s736_s11 = scalar_lea.sflag [#allocation4], %s1492_s6 }
  0x6b   : > { %vm584_vm0 = vcmp.eq.s32.totalorder %v548_v49, %v1527_v58  ;;  %vm585_vm1 = vcmp.eq.s32.totalorder %v549_v50, %v1527_v58  ;;  %vm568_vm2 = vcmp.eq.s32.totalorder %v1506_v36, %v1527_v58  ;;  %vm569_vm3 = vcmp.eq.s32.totalorder %v533_v51, %v1527_v58  ;;  %s1224_s7 = scalar_lea.vmem %s1616_s29, 128  ;;  %s1317_s18 = smov [#allocation7]  }
  0x6c   : > { %482 = vmatpush1.bf16.msra.mxu0 %v1124_v9  ;;  %vm1002_vm4 = vmpackc.low %vm585_vm1, %vm584_vm0  ;;  %vm586_vm5 = vcmp.eq.s32.totalorder %v550_v52, %v1527_v58  ;;  %vm587_vm6 = vcmp.eq.s32.totalorder %v551_v53, %v1527_v58  ;;  %vm570_vm7 = vcmp.eq.s32.totalorder %v534_v54, %v1527_v58  ;;  %vm571_vm8 = vcmp.eq.s32.totalorder %v535_v55, %v1527_v58  ;;  %p1225_p6 = scmp.ne.s32.totalorder %s1616_s29, %s1224_s7  ;;  %s1228_s9 = sshll.u32 %s1317_s18, 4  ;;  %s1229_s9 = int_to_ptr.vmem [resolvable:$false] %s1228_s9 }
  0x6d   : > { %483 = vmatprep.subr.bf16.mxu0 %v1125_v10  ;;  %1003 = vmatprep.subr.msk.bf16.mxu1 %vm1002_vm4, %v1316_v61  ;;  %vm1004_vm9 = vmpackc.low %vm569_vm3, %vm568_vm2  ;;  %vm588_vm10 = vcmp.eq.s32.totalorder %v552_v56, %v1527_v58  ;;  %vm589_vm11 = vcmp.eq.s32.totalorder %v553_v57, %v1527_v58  ;;  %vm572_vm15 = vcmp.eq.s32.totalorder %v536_v59, %v1527_v58  ;;  %v556_v10 = vadd.s32 192, %v1506_v36  ;;  %s1230_s23 = scalar_lea.vmem %s1229_s9, 256  ;;  %p1231_p11 = scmp.lt.s32.totalorder %s1616_s29, %s1229_s9 }
  0x6e   : > { %1005 = vmatpush3.bf16.msk.msra.mxu1 %vm1004_vm9, %v1316_v61  ;;  %vm1006_vm12 = vmpackc.low %vm587_vm6, %vm586_vm5  ;;  %vm573_vm0 = vcmp.eq.s32.totalorder %v537_v60, %v1527_v58  ;;  %vm590_vm1 = vcmp.eq.s32.totalorder %v554_v62, %v1527_v58  ;;  %vm591_vm2 = vcmp.eq.s32.totalorder %v555_v63, %v1527_v58  ;;  %vm574_vm5 = vcmp.eq.s32.totalorder %v538_v0, %v1527_v58  ;;  %p1226_p8 = pnand %p1225_p6, %p1439_p10  ;;  %p1232_p0 = scmp.lt.s32.totalorder %s1230_s23, %s1224_s7 }
  0x6f   : > { %1007 = vmatprep.subr.msk.bf16.mxu1 %vm1006_vm12, %v1316_v61  ;;  %vm1008_vm13 = vmpackc.low %vm571_vm8, %vm570_vm7  ;;  %vm575_vm6 = vcmp.eq.s32.totalorder %v539_v1, %v1527_v58  ;;  %vm592_vm8 = vcmp.eq.s32.totalorder %v556_v10, %v1527_v58  ;;  %vm577_vm12 = vcmp.eq.s32.totalorder %v541_v13, %v1527_v58 }
  0x70   : > { %484 = vmatpush1.bf16.msra.mxu0 %v1127_v11  ;;  %vm1010_vm14 = vmpackc.low %vm589_vm11, %vm588_vm10  ;;  %v557_v11 = vadd.s32 200, %v1506_v36  ;;  %p1227_p12 = pneg %p1226_p8  ;;  %p1233_p5 = por %p1232_p0, %p1231_p11 }
  0x71   : > { %485 = vmatprep.subr.bf16.mxu0 %v1128_v12  ;;  %vm1012_vm3 = vmpackc.low %vm573_vm0, %vm572_vm15  ;;  %v540_v12 = vadd.s32 64, %v1506_v36 }
  0x72   : > { %1009 = vmatpush3.bf16.msk.msra.mxu1 %vm1008_vm13, %v1316_v61  ;;  %vm1014_vm4 = vmpackc.low %vm591_vm2, %vm590_vm1  ;;  %vm593_vm9 = vcmp.eq.s32.totalorder %v557_v11, %v1527_v58  ;;  %p1234_p9 = pnand %p1233_p5, %p1227_p12 }
  0x73   : > { %1011 = vmatprep.subr.msk.bf16.mxu1 %vm1010_vm14, %v1316_v61  ;;  %vm1016_vm7 = vmpackc.low %vm575_vm6, %vm574_vm5  ;;  %vm576_vm11 = vcmp.eq.s32.totalorder %v540_v12, %v1527_v58  ;;  %vm594_vm14 = vcmp.eq.s32.totalorder %v558_v14, %v1527_v58 }
  0x74   : > { %486 = vmatpush1.bf16.msra.mxu0 %v1130_v15  ;;  %vm1018_vm10 = vmpackc.low %vm593_vm9, %vm592_vm8  ;;  %v559_v15 = vadd.s32 216, %v1506_v36 }
  0x75   : > { %487 = vmatprep.subr.bf16.mxu0 %v1131_v16  ;;  %vm1020_vm13 = vmpackc.low %vm577_vm12, %vm576_vm11  ;;  %v542_v16 = vadd.s32 80, %v1506_v36 }
  0x76   : > { %1013 = vmatpush3.bf16.msk.msra.mxu1 %vm1012_vm3, %v1316_v61  ;;  %vm595_vm15 = vcmp.eq.s32.totalorder %v559_v15, %v1527_v58 }
  0x77   : > { %1015 = vmatprep.subr.msk.bf16.mxu1 %vm1014_vm4, %v1316_v61  ;;  %vm578_vm0 = vcmp.eq.s32.totalorder %v542_v16, %v1527_v58  ;;  %vm1022_vm2 = vmpackc.low %vm595_vm15, %vm594_vm14 }
  0x78   : > { %488 = vmatpush1.bf16.msra.mxu0 %v1133_v17  ;;  %v543_v17 = vadd.s32 88, %v1506_v36 }
  0x79   : > { %489 = vmatprep.subr.bf16.mxu0 %v1134_v18  ;;  %v560_v18 = vadd.s32 224, %v1506_v36 }
  0x7a   : > { %1017 = vmatpush3.bf16.msk.msra.mxu1 %vm1016_vm7, %v1316_v61  ;;  %vm579_vm1 = vcmp.eq.s32.totalorder %v543_v17, %v1527_v58 }
  0x7b   : > { %1019 = vmatprep.subr.msk.bf16.mxu1 %vm1018_vm10, %v1316_v61  ;;  %vm596_vm3 = vcmp.eq.s32.totalorder %v560_v18, %v1527_v58  ;;  %vm1024_vm7 = vmpackc.low %vm579_vm1, %vm578_vm0 }
  0x7c   : > { %490 = vmatpush1.bf16.msra.mxu0 %v1136_v19  ;;  %v561_v19 = vadd.s32 232, %v1506_v36 }
  0x7d   : > { %491 = vmatprep.subr.bf16.mxu0 %v1137_v20  ;;  %v544_v20 = vadd.s32 96, %v1506_v36 }
  0x7e   : > { %1021 = vmatpush3.bf16.msk.msra.mxu1 %vm1020_vm13, %v1316_v61  ;;  %vm597_vm4 = vcmp.eq.s32.totalorder %v561_v19, %v1527_v58 }
  0x7f   : > { %vm580_vm5 = vcmp.eq.s32.totalorder %v544_v20, %v1527_v58  ;;  %1023 = vmatprep.subr.msk.bf16.mxu1 %vm1022_vm2, %v1316_v61  ;;  %vm1026_vm8 = vmpackc.low %vm597_vm4, %vm596_vm3 }
  0x80   : > { %492 = vmatpush1.bf16.msra.mxu0 %v1139_v21  ;;  %v545_v21 = vadd.s32 104, %v1506_v36 }
  0x81   : > { %493 = vmatprep.subr.bf16.mxu0 %v1140_v22  ;;  %v562_v22 = vadd.s32 240, %v1506_v36 }
  0x82   : > { %vm581_vm6 = vcmp.eq.s32.totalorder %v545_v21, %v1527_v58  ;;  %1025 = vmatpush3.bf16.msk.msra.mxu1 %vm1024_vm7, %v1316_v61 }
  0x83   : > { %1027 = vmatprep.subr.msk.bf16.mxu1 %vm1026_vm8, %v1316_v61  ;;  %vm1028_vm9 = vmpackc.low %vm581_vm6, %vm580_vm5  ;;  %vm598_vm10 = vcmp.eq.s32.totalorder %v562_v22, %v1527_v58 }
  0x84   : > { %494 = vmatpush1.bf16.msra.mxu0 %v1142_v23  ;;  %v563_v23 = vadd.s32 248, %v1506_v36 }
  0x85   : > { %495 = vmatprep.subr.bf16.mxu0 %v1143_v24  ;;  %v546_v24 = vadd.s32 112, %v1506_v36 }
  0x86   : > { %vm599_vm11 = vcmp.eq.s32.totalorder %v563_v23, %v1527_v58  ;;  %1029 = vmatpush3.bf16.msk.msra.mxu1 %vm1028_vm9, %v1316_v61 }
  0x87   : > { %vm1030_vm12 = vmpackc.low %vm599_vm11, %vm598_vm10  ;;  %vm582_vm13 = vcmp.eq.s32.totalorder %v546_v24, %v1527_v58 }
  0x88   : > { %496 = vmatpush1.bf16.msra.mxu0 %v1145_v25  ;;  %v547_v25 = vadd.s32 120, %v1506_v36  ;;  %1031 = vmatprep.subr.msk.bf16.mxu1 %vm1030_vm12, %v1316_v61 }
  0x89   : > { %497 = vmatprep.subr.bf16.mxu0 %v1146_v26 }
  0x8a   : > { %vm583_vm14 = vcmp.eq.s32.totalorder %v547_v25, %v1527_v58 }
  0x8b   : > { %vm1032_vm15 = vmpackc.low %vm583_vm14, %vm582_vm13 }
  0x8c   : > { %498 = vmatpush1.bf16.msra.mxu0 %v1148_v27  ;;  %1033 = vmatpush3.bf16.msk.msra.mxu1 %vm1032_vm15, %v1316_v61 }
  0x8d   : > { %499 = vmatprep.subr.bf16.mxu0 %v1149_v28 }
  0x90   : > { %500 = vmatpush1.bf16.msra.mxu0 %v1151_v29 }
  0x91   : > { %501 = vmatprep.subr.bf16.mxu0 %v1152_v30 }
  0x94   : > { %502 = vmatpush1.bf16.msra.mxu0 %v1154_v31 }
  0x95   : > { %503 = vmatprep.subr.bf16.mxu0 %v1155_v32 }
  0x98   : > { %504 = vmatpush1.bf16.msra.mxu0 %v1157_v33 }
  0x9b   : > { %506 = vmatmul.mubr.bf16.vlgmr.msra.gmra.mrb[0].mxu0 %v863_v34 }
 0x16e   : > { %v507_v42 = vpop.f32.mrb[0].mxu0 }
 0x16f   : > { %v508_v43 = vadd.f32 %v507_v42, %v299_v40  ;;  %v509_v44 = vpop.f32.mrb[1].mxu0 }
 0x170   : > { %v510_v45 = vadd.f32 %v509_v44, %v303_v41  ;;  %v511_v46 = vpop.f32.mrb[2].mxu0 }
 0x171   : > { %v512_v47 = vpop.f32.mrb[3].mxu0 }
 0x172   : > { %v514_v48 = vmax.f32 %v508_v43, %v510_v45 }
 0x174   : > { %515 = vmax.xlane.f32.xlu0 %v514_v48 }
 0x201   : > { %v516_v2 = vpop.xlane.xlu0 %515 }
 0x202   : > { %v1560_v3 = vsub.f32 %v508_v43, %v516_v2  ;;  %v1562_v4 = vsub.f32 %v510_v45, %v516_v2 }
 0x204   : > { %v519_v5 = vmul.f32 1.442695, %v1560_v3  ;;  %v521_v6 = vmul.f32 1.442695, %v1562_v4 }
 0x206   : > { %1160 = vpow2.f32 %v519_v5 }
 0x207   : > { %1162 = vpow2.f32 %v521_v6 }
 0x210   : > { %v1161_v7 = vpop.eup %1160 }
 0x211   : > { %v1163_v8 = vpop.eup %1162 }
 0x212   : > { %v523_v9 = vadd.f32 %v1163_v8, %v1161_v7 }
 0x214   : > { %524 = vadd.xlane.f32.xlu0 %v523_v9 }
 0x2a1   : > { %v525_v26 = vpop.xlane.xlu0 %524 }
 0x2a2   : > { %1164 = vlog2.f32 %v525_v26 }
 0x2ac   : > { %v1165_v27 = vpop.eup %1164 }
 0x2ad   : > { %v527_v28 = vmul.f32 0.6931472, %v1165_v27 }
 0x2af   : > { %v529_v29 = vsub.f32 %v1562_v4, %v527_v28  ;;  %v528_v30 = vsub.f32 %v1560_v3, %v527_v28 }
 0x2b1   : > { %728 = vmatprep.mubr.f32.mxu1 %v529_v29 }
 0x2b2   : > { %729 = vmatmul.mubr.f32.vlgmr.msra.gmra.mrb[0].mxu1 %v528_v30 }
 0x385   : > { %v999_v31 = vpop.f32.mrb[0].mxu1 }
 0x386   : > { %v1000_v32 = vpop.f32.mrb[1].mxu1 }
 0x387   : > { %v1001_v33 = vadd.f32 %v1000_v32, %v999_v31 }
 0x389   : > { %734 = vst [vmem:[%s257_s12] sm:$0xff] %v1001_v33 }
 0x38a   : > { %1237 = shalt.err (!%p1234_p9)
}
 0x38b   : > { %s1238_s6 = scalar_lea.hbm %s1614_s30, 128  ;;  %s1242_s14 = scalar_lea.hbm %s1667_s4, 256 }
 0x38c   : > { %p1239_p1 = scmp.ne.s32.totalorder %s1614_s30, %s1238_s6  ;;  %p1243_p3 = scmp.lt.u32.totalorder %s1614_s30, %s1667_s4 }
 0x38d   : > { %p1244_p13 = scmp.lt.u32.totalorder %s1242_s14, %s1238_s6  ;;  %p1246_p6 = scmp.lt.u32.totalorder %s1238_s6, %s1614_s30 }
 0x38e   : > { %p1240_p2 = pnand %p1239_p1, %p1439_p10 }
 0x38f   : > { %p1245_p4 = por %p1244_p13, %p1243_p3 }
 0x390   : > { %p1241_p7 = pneg %p1240_p2 }
 0x391   : > { %p1247_p8 = por %p1246_p6, %p1245_p4 }
 0x393   : > { %p1248_p12 = pnand %p1247_p8, %p1241_p7 }
 0x395   : > { %1251 = shalt.err (!%p1248_p12)
}
 0x396   : > { %1040 = dma.vmem_to_hbm [thread:$0]  (%p1439_p10), %s1616_s29, 128, %s1614_s30, %s736_s11  }
 0x397 PF: > { %s762_s28 = sand.u32 1, %s1290_s15   ;;  %p1685_p11 = scmp.ne.s32.totalorder %s1675_s26, 0 }
 0x398   : > { %p1686_p0 = scmp.ge.s32.totalorder %s1310_s20, 2  ;;  %s763_s12 = scalar_lea.sflag [#allocation4], %s762_s28 }
 0x39a   : > { %p1051_p5 = pnand %p1686_p0, %p1685_p11 }
 0x39c   : > { %1285 = dma.done.wait (!%p1051_p5), %s763_s12, 128  }
 0x39d   : > { %1287 = vsyncadd (!%p1051_p5), %s763_s12, 4294967168  ;;  %s21_s20 = sadd.s32 1, %s1310_s20   ;;  %s1687_s15 = smov %s1294_s16 }
 0x39e   : > { %p18_p9 = scmp.ge.s32.totalorder %s21_s20, 4   ;;  %s1688_s16 = smov %s1298_s17 }
 0x39f   : > { %s1689_s17 = smov %s1448_s10  ;;  %s1690_s18 = smov %s1306_s19 }
 0x3a0   : > { %s1691_s19 = smov %s1693_s5  ;;  %20 = sbr.rel (!%p18_p9) target bundleno = 7 (0x7), region = 88 }
 0x3a7   :  { %768 = vsyncpa [#allocation3], 1 }
 0x3a8   :  { %770 = vsyncpa [#allocation3 + $0x1], 1 }
 0x3a9   :  { %771 = vsyncpa [#allocation6], 1 }
 0x3aa   :  { %772 = vsyncpa [#allocation4], 1 }
 0x3ab   :  { %774 = vsyncpa [#allocation4 + $0x1], 1 }

// kernel: tpu_custom_call.1
= control target key start
LH: loop header
LB: loop body
LE: loop exit
PB: predicated region body
PF: predicated region fallthrough
CT: control target
= control target key end

     0   :  { %9 = vsyncpa [#allocation3], 0  ;;  %s1663_s0 = inlined_call_operand.hbm [shape: bf16[2,8,256], index: 0, kind: input, shape index: {}]   ;;  %s1664_s1 = inlined_call_operand.hbm [shape: bf16[256,256], index: 1, kind: input, shape index: {}]   ;;  %s1665_s2 = inlined_call_operand.vmem [shape: f32[1,256], index: 2, kind: input, shape index: {}]   ;;  %s1666_s3 = inlined_call_operand.vmem [shape: s32[2,1,128], index: 3, kind: input, shape index: {}]   ;;  %s1667_s4 = inlined_call_operand.hbm [shape: f32[2,8,128], index: 4, kind: output, shape index: {}]  }
   0x1   :  { %11 = vsyncpa [#allocation3 + $0x1], 0 }
   0x2   :  { %12 = vsyncpa [#allocation6], 0 }
   0x3   :  { %13 = vsyncpa [#allocation4], 0 }
   0x4   :  { %15 = vsyncpa [#allocation4 + $0x1], 0  ;;  %s1343_s15 = smov 0   ;;  %s1345_s16 = smov 0  }
   0x5   :  { %s1347_s17 = smov 0   ;;  %s1349_s18 = smov 0  }
   0x6   :  { %s1351_s19 = smov 0   ;;  %s1353_s20 = smov 0  }
   0x7 LB: > { %s851_s21 = sadd.s32 4294967295, %s1310_s20   ;;  %s852_s22 = sadd.s32 4294967294, %s1310_s20   ;;  %s1310_s20 = sphi %s1353_s20, %s21_s20   ;;  %s1306_s19 = sphi %s1351_s19, %s1691_s19   ;;  %s1302_s18 = sphi %s1349_s18, %s1690_s18   ;;  %s1298_s17 = sphi %s1347_s17, %s1689_s17   ;;  %s1294_s16 = sphi %s1345_s16, %s1688_s16   ;;  %s1290_s15 = sphi %s1343_s15, %s1687_s15  }
   0x8   : > { %p55_p0 = scmp.ne.s32.totalorder %s1294_s16, %s1290_s15  ;;  %p1377_p1 = scmp.eq.s32.totalorder %s851_s21, 0 }
   0x9   : > { %p1381_p2 = scmp.eq.s32.totalorder %s851_s21, 1  ;;  %p155_p3 = scmp.eq.s32.totalorder %s852_s22, 1 }
   0xa   : > { %s1672_s23 = scalar_select %p1377_p1, 1, 0 }
   0xb   : > { %s1673_s24 = scalar_select %p1381_p2, 1, 0 }
   0xc   : > { %p1387_p4 = por %p1377_p1, %p55_p0  ;;  %p853_p5 = scmp.ge.s32.totalorder %s1310_s20, 1 }
   0xd   : > { %p1392_p6 = por %p155_p3, %p55_p0  ;;  %p162_p7 = scmp.lt.s32.totalorder %s1310_s20, 3 }
   0xe   : > { %s1674_s25 = scalar_select %p1387_p4, 1, 0 }
   0xf   : > { %s1675_s26 = scalar_select %p1392_p6, 1, 0 }
  0x10   : > { %p1397_p8 = pnand %p853_p5, %p162_p7  ;;  %s1312_s28 = smov [#allocation5]  }
  0x11   : > { %s174_s29 = sshll.u32 %s1312_s28, 4  ;;  %s33_s5 = sadd.s32 1, %s1306_s19  ;;  %s175_s29 = int_to_ptr.vmem [resolvable:$true] %s174_s29 }
  0x12   : > { %s1676_s27 = scalar_select %p1397_p8, 1, 0 }
  0x13   : > { %p1042_p9 = pneg %p1397_p8  ;;  %s1166_s8 = scalar_lea.hbm %s1664_s1, 4096 }
  0x14   : > { %p1167_p12 = scmp.ne.s32.totalorder %s1664_s1, %s1166_s8  ;;  %p1173_p5 = scmp.lt.u32.totalorder %s1166_s8, %s1664_s1 }
  0x15   : > { %p1406_p11 = pnand %p1042_p9, %p1377_p1 }
  0x17   : > { %p1168_p13 = pneg %p1406_p11 }
  0x19   : > { %p1169_p0 = pnand %p1168_p13, %p1167_p12 }
  0x1b   : > { %p1170_p3 = pneg %p1169_p0 }
  0x1d   : > { %p1175_p7 = pnand %p1173_p5, %p1170_p3 }
  0x1f   : > { %1178 = shalt.err (!%p1175_p7)
}
  0x20   : > { %s1179_s13 = scalar_lea.vmem %s175_s29, 4096  ;;  %p1187_p1 = scmp.lt.s32.totalorder %s175_s29, %s175_s29 }
  0x21   : > { %p1180_p9 = scmp.ne.s32.totalorder %s175_s29, %s1179_s13  ;;  %p1188_p4 = scmp.lt.s32.totalorder %s1179_s13, %s1179_s13 }
  0x23   : > { %p1182_p10 = pnand %p1180_p9, %p1168_p13  ;;  %p1189_p8 = por %p1188_p4, %p1187_p1 }
  0x25   : > { %p1183_p6 = pneg %p1182_p10 }
  0x27   : > { %p1190_p2 = pnand %p1189_p8, %p1183_p6 }
  0x29   : > { %1193 = shalt.err (!%p1190_p2)
}
  0x2a   : > { %s1313_s14 = smov 128   ;;  %s1314_s21 = smov 8  }
  0x2b   : > { %1045 = dma.hbm_to_vmem [thread:$0]  (!%p1406_p11), %s1664_s1, 4096, %s175_s29, [#allocation6], %s1313_s14, %s1313_s14, %s1314_s21  }
  0x2c   : > { %p35_p1 = scmp.ge.s32.totalorder %s33_s5, 2  ;;  %s42_s6 = sadd.s32 1, %s1298_s17 }
  0x2d   : > { %p49_p2 = scmp.ne.s32.totalorder %s1298_s17, %s1294_s16  ;;  %p50_p4 = scmp.eq.s32.totalorder %s1310_s20, 0 }
  0x2e   : > { %s1693_s5 = smov (%p35_p1, %s33_s5), 0  ;;  %p1679_p8 = scmp.ne.s32.totalorder %s1673_s24, 0 }
  0x2f   : > { %p1433_p6 = por %p50_p4, %p49_p2  ;;  %s37_s30 = ssub.s32 %s1306_s19, %s1693_s5 }
  0x30   : > { %p1439_p10 = por %p1679_p8, %p49_p2  ;;  %p1055_p12 = scmp.lt.s32.totalorder %s1310_s20, 2 }
  0x31   : > { %p40_p11 = scmp.eq.s32.totalorder %s37_s30, 0  ;;  %s191_s29 = sand.u32 1, %s1298_s17  }
  0x32   : > { %s856_s9 = sshll.u32 %s191_s29, 3  ;;  %s966_s11 = sshll.u32 %s1306_s19, 7 }
  0x33   : > { %s1448_s10 = scalar_select %p40_p11, %s1298_s17, %s42_s6  }
  0x34   : > { %s1454_s14 = scalar_lea.hbm %s1663_s0, %s966_s11  ;;  %s195_s24 = scalar_lea.vmem [#allocation2], %s856_s9 }
  0x35   : > { %s205_s21 = sshll.u32 %s195_s24, 4  ;;  %p1460_p13 = pnand %p1055_p12, %p1433_p6  ;;  %s1456_s21 = int_to_ptr.vmem [resolvable:$true] %s205_s21 }
  0x36   : > { %s192_s28 = scalar_lea.sflag [#allocation3], %s191_s29  ;;  %s1194_s6 = scalar_lea.hbm %s1454_s14, 128 }
  0x37   : > { %p1195_p0 = scmp.ne.s32.totalorder %s1454_s14, %s1194_s6  ;;  %p1196_p3 = pneg %p1460_p13 }
  0x38   : > { %s1199_s11 = scalar_lea.hbm %s1663_s0, 256  ;;  %p1200_p9 = scmp.lt.u32.totalorder %s1454_s14, %s1663_s0 }
  0x39   : > { %p1197_p5 = pnand %p1196_p3, %p1195_p0  ;;  %p1201_p1 = scmp.lt.u32.totalorder %s1199_s11, %s1194_s6 }
  0x3a   : > { %p1203_p4 = scmp.lt.u32.totalorder %s1194_s6, %s1454_s14 }
  0x3b   : > { %p1198_p7 = pneg %p1197_p5  ;;  %p1202_p2 = por %p1201_p1, %p1200_p9 }
  0x3d   : > { %p1204_p6 = por %p1203_p4, %p1202_p2 }
  0x3f   : > { %p1205_p8 = pnand %p1204_p6, %p1198_p7 }
  0x41   : > { %1208 = shalt.err (!%p1205_p8)
}
  0x42   : > { %s1209_s29 = scalar_lea.vmem %s1456_s21, 128  ;;  %s1315_s13 = smov [#allocation2]  }
  0x43   : > { %p1210_p12 = scmp.ne.s32.totalorder %s1456_s21, %s1209_s29  ;;  %s1214_s24 = sshll.u32 %s1315_s13, 4  ;;  %s1215_s24 = int_to_ptr.vmem [resolvable:$false] %s1214_s24 }
  0x44   : > { %s1216_s30 = scalar_lea.vmem %s1215_s24, 256  ;;  %p1217_p5 = scmp.lt.s32.totalorder %s1456_s21, %s1215_s24 }
  0x45   : > { %p1212_p11 = pnand %p1210_p12, %p1196_p3  ;;  %p1218_p9 = scmp.lt.s32.totalorder %s1216_s30, %s1209_s29 }
  0x47   : > { %p1213_p0 = pneg %p1212_p11  ;;  %p1219_p1 = por %p1218_p9, %p1217_p5 }
  0x49   : > { %p1220_p2 = pnand %p1219_p1, %p1213_p0 }
  0x4b   : > { %1223 = shalt.err (!%p1220_p2)
}
  0x4c   : > { %1049 = dma.hbm_to_vmem [thread:$0]  (!%p1460_p13), %s1454_s14, 128, %s1456_s21, %s192_s28  }
  0x4d   : > { %p1682_p7 = scmp.ne.s32.totalorder %s1676_s27, 0 }
  0x4e   : > { %s1492_s6 = sand.u32 (!%p1682_p7), 1, %s1294_s16   ;;  %p1683_p3 = scmp.ne.s32.totalorder (!%p1682_p7), %s1674_s25, 0 }
  0x4f   : > { %220 = sbr.rel (%p1682_p7) target bundleno = 919 (0x397), region = 36  ;;  %s860_s9 = sshll.u32 (!%p1682_p7), %s1492_s6, 3 }
  0x50   : > { %s223_s11 = scalar_lea.sflag (!%p1682_p7), [#allocation3], %s1492_s6  ;;  %s226_s7 = scalar_lea.vmem (!%p1682_p7), [#allocation2], %s860_s9 }
  0x56   : > { %1277 = dma.done.wait (%p1683_p3), %s223_s11, 128  }
  0x57   : > { %1279 = vsyncadd (%p1683_p3), %s223_s11, 4294967168  ;;  %p1684_p13 = scmp.ne.s32.totalorder %s1672_s23, 0 }
  0x59   : > { %1281 = dma.done.wait (%p1684_p13), [#allocation6], 4096  }
  0x5a   : > { %1283 = vsyncadd (%p1684_p13), [#allocation6], 4294963200  ;;  %v1110_v0 = vld [vmem:[#allocation5 + $0x4] ss:$8 sps:$4 sm:$0xff]   ;;  %v1112_v1 = vld [vmem:[#allocation5] ss:$8 sps:$4 sm:$0xff]   ;;  %v296_v35 = vlaneseq }
  0x5b   : > { %473 = vmatprep.subr.bf16.mxu0 %v1110_v0  ;;  %v1113_v2 = vld [vmem:[#allocation5 + $0x14] ss:$8 sps:$4 sm:$0xff]   ;;  %v1115_v3 = vld [vmem:[#allocation5 + $0x10] ss:$8 sps:$4 sm:$0xff]   ;;  %v1116_v4 = vld [vmem:[#allocation5 + $0x24] ss:$8 sps:$4 sm:$0xff]  }
  0x5c   : > { %474 = vmatpush1.bf16.msra.mxu0 %v1112_v1  ;;  %v1118_v5 = vld [vmem:[#allocation5 + $0x20] ss:$8 sps:$4 sm:$0xff]   ;;  %v1119_v6 = vld [vmem:[#allocation5 + $0x34] ss:$8 sps:$4 sm:$0xff]   ;;  %v1121_v7 = vld [vmem:[#allocation5 + $0x30] ss:$8 sps:$4 sm:$0xff]  }
  0x5d   : > { %475 = vmatprep.subr.bf16.mxu0 %v1113_v2  ;;  %v1122_v8 = vld [vmem:[#allocation5 + $0x44] ss:$8 sps:$4 sm:$0xff]   ;;  %v1124_v9 = vld [vmem:[#allocation5 + $0x40] ss:$8 sps:$4 sm:$0xff]   ;;  %v1125_v10 = vld [vmem:[#allocation5 + $0x54] ss:$8 sps:$4 sm:$0xff]  }
  0x5e   : > { %v1127_v11 = vld [vmem:[#allocation5 + $0x50] ss:$8 sps:$4 sm:$0xff]   ;;  %v1128_v12 = vld [vmem:[#allocation5 + $0x64] ss:$8 sps:$4 sm:$0xff]   ;;  %v1130_v15 = vld [vmem:[#allocation5 + $0x60] ss:$8 sps:$4 sm:$0xff]  }
  0x5f   : > { %v261_v13 = vld [vmem:[%s226_s7] sm:$0xff]  ;;  %v1134_v18 = vld [vmem:[#allocation5 + $0x84] ss:$8 sps:$4 sm:$0xff]   ;;  %v1136_v19 = vld [vmem:[#allocation5 + $0x80] ss:$8 sps:$4 sm:$0xff]   ;;  %v1506_v36 = vshrl.u32 %v296_v35, 7 }
  0x60   : > { %476 = vmatpush1.bf16.msra.mxu0 %v1115_v3  ;;  %v864_v14 = vcombine.high %v261_v13, %v261_v13  ;;  %v1131_v16 = vld [vmem:[#allocation5 + $0x74] ss:$8 sps:$4 sm:$0xff]   ;;  %v1133_v17 = vld [vmem:[#allocation5 + $0x70] ss:$8 sps:$4 sm:$0xff]   ;;  %v1140_v22 = vld [vmem:[#allocation5 + $0xa4] ss:$8 sps:$4 sm:$0xff]   ;;  %v863_v34 = vcombine.low %v261_v13, %v261_v13 }
  0x61   : > { %477 = vmatprep.subr.bf16.mxu0 %v1116_v4  ;;  %v1137_v20 = vld [vmem:[#allocation5 + $0x94] ss:$8 sps:$4 sm:$0xff]   ;;  %v1139_v21 = vld [vmem:[#allocation5 + $0x90] ss:$8 sps:$4 sm:$0xff]   ;;  %v1142_v23 = vld [vmem:[#allocation5 + $0xa0] ss:$8 sps:$4 sm:$0xff]  }
  0x62   : > { %505 = vmatprep.mubr.bf16.mxu0 %v864_v14  ;;  %v1143_v24 = vld [vmem:[#allocation5 + $0xb4] ss:$8 sps:$4 sm:$0xff]   ;;  %v1145_v25 = vld [vmem:[#allocation5 + $0xb0] ss:$8 sps:$4 sm:$0xff]   ;;  %v1146_v26 = vld [vmem:[#allocation5 + $0xc4] ss:$8 sps:$4 sm:$0xff]  }
  0x63   : > { %v1148_v27 = vld [vmem:[#allocation5 + $0xc0] ss:$8 sps:$4 sm:$0xff]   ;;  %v1149_v28 = vld [vmem:[#allocation5 + $0xd4] ss:$8 sps:$4 sm:$0xff]   ;;  %v1151_v29 = vld [vmem:[#allocation5 + $0xd0] ss:$8 sps:$4 sm:$0xff]  }
  0x64   : > { %478 = vmatpush1.bf16.msra.mxu0 %v1118_v5  ;;  %v1152_v30 = vld [vmem:[#allocation5 + $0xe4] ss:$8 sps:$4 sm:$0xff]   ;;  %v1154_v31 = vld [vmem:[#allocation5 + $0xe0] ss:$8 sps:$4 sm:$0xff]   ;;  %v1155_v32 = vld [vmem:[#allocation5 + $0xf4] ss:$8 sps:$4 sm:$0xff]  }
  0x65   : > { %479 = vmatprep.subr.bf16.mxu0 %v1119_v6  ;;  %v1157_v33 = vld [vmem:[#allocation5 + $0xf0] ss:$8 sps:$4 sm:$0xff]   ;;  %v298_v37 = vsub.s32 0, %v1506_v36  ;;  %v302_v39 = vsub.s32 1, %v1506_v36  ;;  %p258_p4 = scmp.lt.s32.totalorder %s1302_s18, 1  ;;  %v548_v49 = vadd.s32 128, %v1506_v36 }
  0x66   : > { %v294_v38 = vld [vmem:[%s1665_s2] sm:$0x3]  ;;  %v549_v50 = vadd.s32 136, %v1506_v36  ;;  %v533_v51 = vadd.s32 8, %v1506_v36  ;;  %v550_v52 = vadd.s32 144, %v1506_v36  ;;  %v551_v53 = vadd.s32 152, %v1506_v36 }
  0x67   : > { %v299_v40 = vrot.slane %v294_v38, %v298_v37  ;;  %v303_v41 = vrot.slane %v294_v38, %v302_v39  ;;  %s259_s27 = scalar_select %p258_p4, %s1302_s18, 1  ;;  %v534_v54 = vadd.s32 16, %v1506_v36  ;;  %v535_v55 = vadd.s32 24, %v1506_v36 }
  0x68   : > { %480 = vmatpush1.bf16.msra.mxu0 %v1121_v7  ;;  %v552_v56 = vadd.s32 160, %v1506_v36  ;;  %v553_v57 = vadd.s32 168, %v1506_v36  ;;  %v536_v59 = vadd.s32 32, %v1506_v36  ;;  %v537_v60 = vadd.s32 40, %v1506_v36  ;;  %s963_s28 = sshll.u32 %s1302_s18, 7  ;;  %s257_s12 = scalar_lea.vmem [#allocation7], %s860_s9 }
  0x69   : > { %481 = vmatprep.subr.bf16.mxu0 %v1122_v8  ;;  %s260_s22 = scalar_lea.vmem %s1666_s3, %s259_s27  ;;  %v1316_v61 = vmov 1.0|1.0   ;;  %v554_v62 = vadd.s32 176, %v1506_v36  ;;  %v555_v63 = vadd.s32 184, %v1506_v36  ;;  %v538_v0 = vadd.s32 48, %v1506_v36  ;;  %s750_s29 = sshll.u32 %s257_s12, 4  ;;  %s1616_s29 = int_to_ptr.vmem [resolvable:$true] %s750_s29 }
  0x6a   : > { %v1527_v58 = vld [vmem:[%s260_s22] ss:$0 sm:$0xff]  ;;  %v539_v1 = vadd.s32 56, %v1506_v36  ;;  %v541_v13 = vadd.s32 72, %v1506_v36  ;;  %v558_v14 = vadd.s32 208, %v1506_v36  ;;  %s1614_s30 = scalar_lea.hbm %s1667_s4, %s963_s28  ;;  %s736_s11 = scalar_lea.sflag [#allocation4], %s1492_s6 }
  0x6b   : > { %vm584_vm0 = vcmp.eq.s32.totalorder %v548_v49, %v1527_v58  ;;  %vm585_vm1 = vcmp.eq.s32.totalorder %v549_v50, %v1527_v58  ;;  %vm568_vm2 = vcmp.eq.s32.totalorder %v1506_v36, %v1527_v58  ;;  %vm569_vm3 = vcmp.eq.s32.totalorder %v533_v51, %v1527_v58  ;;  %s1224_s7 = scalar_lea.vmem %s1616_s29, 128  ;;  %s1317_s18 = smov [#allocation7]  }
  0x6c   : > { %482 = vmatpush1.bf16.msra.mxu0 %v1124_v9  ;;  %vm1002_vm4 = vmpackc.low %vm585_vm1, %vm584_vm0  ;;  %vm586_vm5 = vcmp.eq.s32.totalorder %v550_v52, %v1527_v58  ;;  %vm587_vm6 = vcmp.eq.s32.totalorder %v551_v53, %v1527_v58  ;;  %vm570_vm7 = vcmp.eq.s32.totalorder %v534_v54, %v1527_v58  ;;  %vm571_vm8 = vcmp.eq.s32.totalorder %v535_v55, %v1527_v58  ;;  %p1225_p6 = scmp.ne.s32.totalorder %s1616_s29, %s1224_s7  ;;  %s1228_s9 = sshll.u32 %s1317_s18, 4  ;;  %s1229_s9 = int_to_ptr.vmem [resolvable:$false] %s1228_s9 }
  0x6d   : > { %483 = vmatprep.subr.bf16.mxu0 %v1125_v10  ;;  %1003 = vmatprep.subr.msk.bf16.mxu1 %vm1002_vm4, %v1316_v61  ;;  %vm1004_vm9 = vmpackc.low %vm569_vm3, %vm568_vm2  ;;  %vm588_vm10 = vcmp.eq.s32.totalorder %v552_v56, %v1527_v58  ;;  %vm589_vm11 = vcmp.eq.s32.totalorder %v553_v57, %v1527_v58  ;;  %vm572_vm15 = vcmp.eq.s32.totalorder %v536_v59, %v1527_v58  ;;  %v556_v10 = vadd.s32 192, %v1506_v36  ;;  %s1230_s23 = scalar_lea.vmem %s1229_s9, 256  ;;  %p1231_p11 = scmp.lt.s32.totalorder %s1616_s29, %s1229_s9 }
  0x6e   : > { %1005 = vmatpush3.bf16.msk.msra.mxu1 %vm1004_vm9, %v1316_v61  ;;  %vm1006_vm12 = vmpackc.low %vm587_vm6, %vm586_vm5  ;;  %vm573_vm0 = vcmp.eq.s32.totalorder %v537_v60, %v1527_v58  ;;  %vm590_vm1 = vcmp.eq.s32.totalorder %v554_v62, %v1527_v58  ;;  %vm591_vm2 = vcmp.eq.s32.totalorder %v555_v63, %v1527_v58  ;;  %vm574_vm5 = vcmp.eq.s32.totalorder %v538_v0, %v1527_v58  ;;  %p1226_p8 = pnand %p1225_p6, %p1439_p10  ;;  %p1232_p0 = scmp.lt.s32.totalorder %s1230_s23, %s1224_s7 }
  0x6f   : > { %1007 = vmatprep.subr.msk.bf16.mxu1 %vm1006_vm12, %v1316_v61  ;;  %vm1008_vm13 = vmpackc.low %vm571_vm8, %vm570_vm7  ;;  %vm575_vm6 = vcmp.eq.s32.totalorder %v539_v1, %v1527_v58  ;;  %vm592_vm8 = vcmp.eq.s32.totalorder %v556_v10, %v1527_v58  ;;  %vm577_vm12 = vcmp.eq.s32.totalorder %v541_v13, %v1527_v58 }
  0x70   : > { %484 = vmatpush1.bf16.msra.mxu0 %v1127_v11  ;;  %vm1010_vm14 = vmpackc.low %vm589_vm11, %vm588_vm10  ;;  %v557_v11 = vadd.s32 200, %v1506_v36  ;;  %p1227_p12 = pneg %p1226_p8  ;;  %p1233_p5 = por %p1232_p0, %p1231_p11 }
  0x71   : > { %485 = vmatprep.subr.bf16.mxu0 %v1128_v12  ;;  %vm1012_vm3 = vmpackc.low %vm573_vm0, %vm572_vm15  ;;  %v540_v12 = vadd.s32 64, %v1506_v36 }
  0x72   : > { %1009 = vmatpush3.bf16.msk.msra.mxu1 %vm1008_vm13, %v1316_v61  ;;  %vm1014_vm4 = vmpackc.low %vm591_vm2, %vm590_vm1  ;;  %vm593_vm9 = vcmp.eq.s32.totalorder %v557_v11, %v1527_v58  ;;  %p1234_p9 = pnand %p1233_p5, %p1227_p12 }
  0x73   : > { %1011 = vmatprep.subr.msk.bf16.mxu1 %vm1010_vm14, %v1316_v61  ;;  %vm1016_vm7 = vmpackc.low %vm575_vm6, %vm574_vm5  ;;  %vm576_vm11 = vcmp.eq.s32.totalorder %v540_v12, %v1527_v58  ;;  %vm594_vm14 = vcmp.eq.s32.totalorder %v558_v14, %v1527_v58 }
  0x74   : > { %486 = vmatpush1.bf16.msra.mxu0 %v1130_v15  ;;  %vm1018_vm10 = vmpackc.low %vm593_vm9, %vm592_vm8  ;;  %v559_v15 = vadd.s32 216, %v1506_v36 }
  0x75   : > { %487 = vmatprep.subr.bf16.mxu0 %v1131_v16  ;;  %vm1020_vm13 = vmpackc.low %vm577_vm12, %vm576_vm11  ;;  %v542_v16 = vadd.s32 80, %v1506_v36 }
  0x76   : > { %1013 = vmatpush3.bf16.msk.msra.mxu1 %vm1012_vm3, %v1316_v61  ;;  %vm595_vm15 = vcmp.eq.s32.totalorder %v559_v15, %v1527_v58 }
  0x77   : > { %1015 = vmatprep.subr.msk.bf16.mxu1 %vm1014_vm4, %v1316_v61  ;;  %vm578_vm0 = vcmp.eq.s32.totalorder %v542_v16, %v1527_v58  ;;  %vm1022_vm2 = vmpackc.low %vm595_vm15, %vm594_vm14 }
  0x78   : > { %488 = vmatpush1.bf16.msra.mxu0 %v1133_v17  ;;  %v543_v17 = vadd.s32 88, %v1506_v36 }
  0x79   : > { %489 = vmatprep.subr.bf16.mxu0 %v1134_v18  ;;  %v560_v18 = vadd.s32 224, %v1506_v36 }
  0x7a   : > { %1017 = vmatpush3.bf16.msk.msra.mxu1 %vm1016_vm7, %v1316_v61  ;;  %vm579_vm1 = vcmp.eq.s32.totalorder %v543_v17, %v1527_v58 }
  0x7b   : > { %1019 = vmatprep.subr.msk.bf16.mxu1 %vm1018_vm10, %v1316_v61  ;;  %vm596_vm3 = vcmp.eq.s32.totalorder %v560_v18, %v1527_v58  ;;  %vm1024_vm7 = vmpackc.low %vm579_vm1, %vm578_vm0 }
  0x7c   : > { %490 = vmatpush1.bf16.msra.mxu0 %v1136_v19  ;;  %v561_v19 = vadd.s32 232, %v1506_v36 }
  0x7d   : > { %491 = vmatprep.subr.bf16.mxu0 %v1137_v20  ;;  %v544_v20 = vadd.s32 96, %v1506_v36 }
  0x7e   : > { %1021 = vmatpush3.bf16.msk.msra.mxu1 %vm1020_vm13, %v1316_v61  ;;  %vm597_vm4 = vcmp.eq.s32.totalorder %v561_v19, %v1527_v58 }
  0x7f   : > { %vm580_vm5 = vcmp.eq.s32.totalorder %v544_v20, %v1527_v58  ;;  %1023 = vmatprep.subr.msk.bf16.mxu1 %vm1022_vm2, %v1316_v61  ;;  %vm1026_vm8 = vmpackc.low %vm597_vm4, %vm596_vm3 }
  0x80   : > { %492 = vmatpush1.bf16.msra.mxu0 %v1139_v21  ;;  %v545_v21 = vadd.s32 104, %v1506_v36 }
  0x81   : > { %493 = vmatprep.subr.bf16.mxu0 %v1140_v22  ;;  %v562_v22 = vadd.s32 240, %v1506_v36 }
  0x82   : > { %vm581_vm6 = vcmp.eq.s32.totalorder %v545_v21, %v1527_v58  ;;  %1025 = vmatpush3.bf16.msk.msra.mxu1 %vm1024_vm7, %v1316_v61 }
  0x83   : > { %1027 = vmatprep.subr.msk.bf16.mxu1 %vm1026_vm8, %v1316_v61  ;;  %vm1028_vm9 = vmpackc.low %vm581_vm6, %vm580_vm5  ;;  %vm598_vm10 = vcmp.eq.s32.totalorder %v562_v22, %v1527_v58 }
  0x84   : > { %494 = vmatpush1.bf16.msra.mxu0 %v1142_v23  ;;  %v563_v23 = vadd.s32 248, %v1506_v36 }
  0x85   : > { %495 = vmatprep.subr.bf16.mxu0 %v1143_v24  ;;  %v546_v24 = vadd.s32 112, %v1506_v36 }
  0x86   : > { %vm599_vm11 = vcmp.eq.s32.totalorder %v563_v23, %v1527_v58  ;;  %1029 = vmatpush3.bf16.msk.msra.mxu1 %vm1028_vm9, %v1316_v61 }
  0x87   : > { %vm1030_vm12 = vmpackc.low %vm599_vm11, %vm598_vm10  ;;  %vm582_vm13 = vcmp.eq.s32.totalorder %v546_v24, %v1527_v58 }
  0x88   : > { %496 = vmatpush1.bf16.msra.mxu0 %v1145_v25  ;;  %v547_v25 = vadd.s32 120, %v1506_v36  ;;  %1031 = vmatprep.subr.msk.bf16.mxu1 %vm1030_vm12, %v1316_v61 }
  0x89   : > { %497 = vmatprep.subr.bf16.mxu0 %v1146_v26 }
  0x8a   : > { %vm583_vm14 = vcmp.eq.s32.totalorder %v547_v25, %v1527_v58 }
  0x8b   : > { %vm1032_vm15 = vmpackc.low %vm583_vm14, %vm582_vm13 }
  0x8c   : > { %498 = vmatpush1.bf16.msra.mxu0 %v1148_v27  ;;  %1033 = vmatpush3.bf16.msk.msra.mxu1 %vm1032_vm15, %v1316_v61 }
  0x8d   : > { %499 = vmatprep.subr.bf16.mxu0 %v1149_v28 }
  0x90   : > { %500 = vmatpush1.bf16.msra.mxu0 %v1151_v29 }
  0x91   : > { %501 = vmatprep.subr.bf16.mxu0 %v1152_v30 }
  0x94   : > { %502 = vmatpush1.bf16.msra.mxu0 %v1154_v31 }
  0x95   : > { %503 = vmatprep.subr.bf16.mxu0 %v1155_v32 }
  0x98   : > { %504 = vmatpush1.bf16.msra.mxu0 %v1157_v33 }
  0x9b   : > { %506 = vmatmul.mubr.bf16.vlgmr.msra.gmra.mrb[0].mxu0 %v863_v34 }
 0x16e   : > { %v507_v42 = vpop.f32.mrb[0].mxu0 }
 0x16f   : > { %v508_v43 = vadd.f32 %v507_v42, %v299_v40  ;;  %v509_v44 = vpop.f32.mrb[1].mxu0 }
 0x170   : > { %v510_v45 = vadd.f32 %v509_v44, %v303_v41  ;;  %v511_v46 = vpop.f32.mrb[2].mxu0 }
 0x171   : > { %v512_v47 = vpop.f32.mrb[3].mxu0 }
 0x172   : > { %v514_v48 = vmax.f32 %v508_v43, %v510_v45 }
 0x174   : > { %515 = vmax.xlane.f32.xlu0 %v514_v48 }
 0x201   : > { %v516_v2 = vpop.xlane.xlu0 %515 }
 0x202   : > { %v1560_v3 = vsub.f32 %v508_v43, %v516_v2  ;;  %v1562_v4 = vsub.f32 %v510_v45, %v516_v2 }
 0x204   : > { %v519_v5 = vmul.f32 1.442695, %v1560_v3  ;;  %v521_v6 = vmul.f32 1.442695, %v1562_v4 }
 0x206   : > { %1160 = vpow2.f32 %v519_v5 }
 0x207   : > { %1162 = vpow2.f32 %v521_v6 }
 0x210   : > { %v1161_v7 = vpop.eup %1160 }
 0x211   : > { %v1163_v8 = vpop.eup %1162 }
 0x212   : > { %v523_v9 = vadd.f32 %v1163_v8, %v1161_v7 }
 0x214   : > { %524 = vadd.xlane.f32.xlu0 %v523_v9 }
 0x2a1   : > { %v525_v26 = vpop.xlane.xlu0 %524 }
 0x2a2   : > { %1164 = vlog2.f32 %v525_v26 }
 0x2ac   : > { %v1165_v27 = vpop.eup %1164 }
 0x2ad   : > { %v527_v28 = vmul.f32 0.6931472, %v1165_v27 }
 0x2af   : > { %v529_v29 = vsub.f32 %v1562_v4, %v527_v28  ;;  %v528_v30 = vsub.f32 %v1560_v3, %v527_v28 }
 0x2b1   : > { %728 = vmatprep.mubr.f32.mxu1 %v529_v29 }
 0x2b2   : > { %729 = vmatmul.mubr.f32.vlgmr.msra.gmra.mrb[0].mxu1 %v528_v30 }
 0x385   : > { %v999_v31 = vpop.f32.mrb[0].mxu1 }
 0x386   : > { %v1000_v32 = vpop.f32.mrb[1].mxu1 }
 0x387   : > { %v1001_v33 = vadd.f32 %v1000_v32, %v999_v31 }
 0x389   : > { %734 = vst [vmem:[%s257_s12] sm:$0xff] %v1001_v33 }
 0x38a   : > { %1237 = shalt.err (!%p1234_p9)
}
 0x38b   : > { %s1238_s6 = scalar_lea.hbm %s1614_s30, 128  ;;  %s1242_s14 = scalar_lea.hbm %s1667_s4, 256 }
 0x38c   : > { %p1239_p1 = scmp.ne.s32.totalorder %s1614_s30, %s1238_s6  ;;  %p1243_p3 = scmp.lt.u32.totalorder %s1614_s30, %s1667_s4 }
 0x38d   : > { %p1244_p13 = scmp.lt.u32.totalorder %s1242_s14, %s1238_s6  ;;  %p1246_p6 = scmp.lt.u32.totalorder %s1238_s6, %s1614_s30 }
 0x38e   : > { %p1240_p2 = pnand %p1239_p1, %p1439_p10 }
 0x38f   : > { %p1245_p4 = por %p1244_p13, %p1243_p3 }
 0x390   : > { %p1241_p7 = pneg %p1240_p2 }
 0x391   : > { %p1247_p8 = por %p1246_p6, %p1245_p4 }
 0x393   : > { %p1248_p12 = pnand %p1247_p8, %p1241_p7 }
 0x395   : > { %1251 = shalt.err (!%p1248_p12)
}
 0x396   : > { %1040 = dma.vmem_to_hbm [thread:$0]  (%p1439_p10), %s1616_s29, 128, %s1614_s30, %s736_s11  }
 0x397 PF: > { %s762_s28 = sand.u32 1, %s1290_s15   ;;  %p1685_p11 = scmp.ne.s32.totalorder %s1675_s26, 0 }
 0x398   : > { %p1686_p0 = scmp.ge.s32.totalorder %s1310_s20, 2  ;;  %s763_s12 = scalar_lea.sflag [#allocation4], %s762_s28 }
 0x39a   : > { %p1051_p5 = pnand %p1686_p0, %p1685_p11 }
 0x39c   : > { %1285 = dma.done.wait (!%p1051_p5), %s763_s12, 128  }
 0x39d   : > { %1287 = vsyncadd (!%p1051_p5), %s763_s12, 4294967168  ;;  %s21_s20 = sadd.s32 1, %s1310_s20   ;;  %s1687_s15 = smov %s1294_s16 }
 0x39e   : > { %p18_p9 = scmp.ge.s32.totalorder %s21_s20, 4   ;;  %s1688_s16 = smov %s1298_s17 }
 0x39f   : > { %s1689_s17 = smov %s1448_s10  ;;  %s1690_s18 = smov %s1306_s19 }
 0x3a0   : > { %s1691_s19 = smov %s1693_s5  ;;  %20 = sbr.rel (!%p18_p9) target bundleno = 7 (0x7), region = 88 }
 0x3a7   :  { %768 = vsyncpa [#allocation3], 1 }
 0x3a8   :  { %770 = vsyncpa [#allocation3 + $0x1], 1 }
 0x3a9   :  { %771 = vsyncpa [#allocation6], 1 }
 0x3aa   :  { %772 = vsyncpa [#allocation4], 1 }
 0x3ab   :  { %774 = vsyncpa [#allocation4 + $0x1], 1 }

</bundles_post_ra>
